<compile_context>
chip_gen: v7x
topology: tpu7x:2x2x1
jax: 0.10.0
libtpu: 0.0.40
codegen_flags: <defaults>
</compile_context>

<pallas_src>
import jax
import jax.numpy as jnp
from jax.experimental import pallas as pl
from jax.experimental.pallas import tpu as pltpu


# Below this element count, kernel-launch overhead dominates a KB-scale copy;
# use a plain XLA copy instead of a dedicated custom call.
_TINY_COPY_ELEMS = 1024

_LANE = 128
_LANE_CAP = 2048  # lane-dense last dim: wide multiple of 128 for dense DMAs


# --------------------------------------------------------------------------
# torch.view shape resolution (single -1 allowed, strict divisibility check).
# --------------------------------------------------------------------------
def _resolve_view_shape(total, shape):
    shape = list(shape)
    neg = [i for i, s in enumerate(shape) if s == -1]
    if len(neg) > 1:
        raise ValueError("view(): only one dimension can be inferred (-1)")
    if neg:
        known = 1
        for s in shape:
            if s != -1:
                known *= s
        if known == 0 or total % known != 0:
            raise ValueError(
                f"view(): shape {tuple(shape)} is invalid for input of size {total}")
        shape[neg[0]] = total // known
    out = 1
    for s in shape:
        out *= s
    if out != total:
        raise ValueError(
            f"view(): shape {tuple(shape)} is invalid for input of size {total}")
    return tuple(shape)


# --------------------------------------------------------------------------
# Direct HBM->HBM DMA copy of the flat, 128-divisible element stream.
# --------------------------------------------------------------------------
def _pallas_dma_copy(x_flat):
    total = x_flat.size
    itemsize = jnp.dtype(x_flat.dtype).itemsize

    # Factor the flat stream as a lane-dense (rows, C) slab, C a power-of-two
    # multiple of 128 up to _LANE_CAP, so every DMA descriptor is fully dense.
    c = _LANE
    while c * 2 <= _LANE_CAP and total % (c * 2) == 0:
        c *= 2
    rows = total // c
    x2d = x_flat.reshape(rows, c)

    # 2-4 chunked DMAs keep several transfers in flight (overlapped read/write
    # streams); the chunk count must divide `rows` so every chunk is identical
    # and dense — no ragged / masked tail.
    n_chunks = 1
    for cand in (4, 2):
        if rows % cand == 0:
            n_chunks = cand
            break
    rows_per_chunk = rows // n_chunks

    def kernel(x_ref, o_ref, sems):
        # Raw HBM refs (memory_space=pl.ANY): issue all chunk DMAs, then wait.
        copies = []
        for ci in range(n_chunks):               # static Python loop
            lo = ci * rows_per_chunk
            cp = pltpu.make_async_copy(
                x_ref.at[pl.ds(lo, rows_per_chunk), :],
                o_ref.at[pl.ds(lo, rows_per_chunk), :],
                sems.at[ci])
            cp.start()
            copies.append(cp)
        for cp in copies:
            cp.wait()

    out2d = pl.pallas_call(
        kernel,
        out_shape=jax.ShapeDtypeStruct((rows, c), x2d.dtype),
        in_specs=[pl.BlockSpec(memory_space=pl.ANY)],
        out_specs=pl.BlockSpec(memory_space=pl.ANY),
        scratch_shapes=[pltpu.SemaphoreType.DMA((n_chunks,))],
        cost_estimate=pl.CostEstimate(
            flops=0, transcendentals=0, bytes_accessed=2 * total * itemsize),
    )(x2d)
    return out2d.reshape(total)


def _materialized_copy(x):
    total = x.size
    x_flat = x.reshape(total)
    if total < _TINY_COPY_ELEMS or total % _LANE != 0:
        # Still a real materialized copy (never a silent alias); XLA handles
        # tiny / oddly-sized streams more cheaply than a custom call.
        # TODO(synk): dense DMA path for large element counts not divisible by 128.
        return jnp.copy(x_flat)
    return _pallas_dma_copy(x_flat)


# --------------------------------------------------------------------------
# Public wrapper mirroring the PyTorch module.
# --------------------------------------------------------------------------
def pallas_view(x, shape, *, materialize=False):
    """Equivalent of torch.Tensor.view(*shape) on a contiguous tensor.

    materialize=False (default): metadata-only reshape, zero HBM traffic —
        identical semantics to torch.view (and to donating the input buffer,
        i.e. the input_output_aliases={0:0} variant from the perf review).
    materialize=True: produce a fresh buffer via a direct HBM->HBM DMA.
    """
    out_shape = _resolve_view_shape(x.size, shape)
    if not materialize:
        return x.reshape(out_shape)
    return _materialized_copy(x).reshape(out_shape)


class View:
    """Drop-in analogue of the PyTorch View module."""

    def __init__(self, shape, materialize=False):
        self.shape = tuple(shape)
        self.materialize = materialize

    def __call__(self, x):
        return pallas_view(x, self.shape, materialize=self.materialize)


if __name__ == "__main__":
    key = jax.random.PRNGKey(0)
    # NCHW feature map, consistent with the conv-net context of the module.
    x = jax.random.normal(key, (2, 4, 16, 16), dtype=jnp.float32)

    # View((-1, 256)): (2,4,16,16) -> (8, 256)
    y_fast = View((-1, 256))(x)                       # metadata-only path
    y_copy = View((-1, 256), materialize=True)(x)     # HBM->HBM DMA copy path
    y_fast, y_copy = jax.block_until_ready((y_fast, y_copy))

    y_ref = x.reshape(8, 256)
    assert y_fast.shape == (8, 256) and jnp.array_equal(y_fast, y_ref), "view mismatch"
    assert y_copy.shape == (8, 256) and jnp.array_equal(y_copy, y_ref), "DMA copy mismatch"

    # -1 resolution elsewhere: (2, -1) -> (2, 1024)
    z = View((2, -1), materialize=True)(x)
    z = jax.block_until_ready(z)
    assert z.shape == (2, 1024) and jnp.array_equal(z, x.reshape(2, 1024))

    # Larger tensor exercising the 4-way chunked DMA path (rows=16, C=2048).
    x2 = jax.random.normal(jax.random.PRNGKey(0), (4, 8, 32, 32), dtype=jnp.float32)
    w = View((-1, 1024), materialize=True)(x2)
    w = jax.block_until_ready(w)
    assert w.shape == (32, 1024) and jnp.array_equal(w, x2.reshape(32, 1024))

    # Non-128-divisible / tiny size: materialized via XLA copy, never aliased.
    x3 = jax.random.normal(key, (3, 5, 7), dtype=jnp.float32)
    v = View((-1,), materialize=True)(x3)
    v = jax.block_until_ready(v)
    assert v.shape == (105,) and jnp.array_equal(v, x3.reshape(105))

    print("KERNEL_OK")
</pallas_src>

<mosaic_0001>
module attributes {stable_mosaic.version = 11 : i64} {
  func.func @kernel(%arg0: memref<1x2048xf32, #tpu.memory_space<any>>, %arg1: memref<1x2048xf32, #tpu.memory_space<any>>, %arg2: memref<1x!tpu.dma_semaphore, #tpu.memory_space<semaphore_mem>>) attributes {dimension_semantics = [], scalar_prefetch = 0 : i64, scratch_operands = 1 : i64, tpu.core_type = #tpu.core_type<tc>} {
    %c0_i32 = arith.constant 0 : i32
    %c0_i32_0 = arith.constant 0 : i32
    %c0_i32_1 = arith.constant 0 : i32
    %0 = tpu.memref_slice %arg0[%c0_i32_0, %c0_i32_1] : memref<1x2048xf32, #tpu.memory_space<any>> -> memref<1x2048xf32, #tpu.memory_space<any>>
    %c0_i32_2 = arith.constant 0 : i32
    %c0_i32_3 = arith.constant 0 : i32
    %1 = tpu.memref_slice %arg1[%c0_i32_2, %c0_i32_3] : memref<1x2048xf32, #tpu.memory_space<any>> -> memref<1x2048xf32, #tpu.memory_space<any>>
    %2 = tpu.memref_slice %arg2[%c0_i32] : memref<1x!tpu.dma_semaphore, #tpu.memory_space<semaphore_mem>> -> memref<1x!tpu.dma_semaphore, #tpu.memory_space<semaphore_mem>>
    %3 = tpu.memref_squeeze %2 : memref<1x!tpu.dma_semaphore, #tpu.memory_space<semaphore_mem>> -> memref<!tpu.dma_semaphore, #tpu.memory_space<semaphore_mem>>
    tpu.enqueue_dma source(%0 : memref<1x2048xf32, #tpu.memory_space<any>>) target(%1 : memref<1x2048xf32, #tpu.memory_space<any>>) target_semaphore(%3 : memref<!tpu.dma_semaphore, #tpu.memory_space<semaphore_mem>>)
    %c0_i32_4 = arith.constant 0 : i32
    %c0_i32_5 = arith.constant 0 : i32
    %c0_i32_6 = arith.constant 0 : i32
    %4 = tpu.memref_slice %arg0[%c0_i32_5, %c0_i32_6] : memref<1x2048xf32, #tpu.memory_space<any>> -> memref<1x2048xf32, #tpu.memory_space<any>>
    %c0_i32_7 = arith.constant 0 : i32
    %c0_i32_8 = arith.constant 0 : i32
    %5 = tpu.memref_slice %arg1[%c0_i32_7, %c0_i32_8] : memref<1x2048xf32, #tpu.memory_space<any>> -> memref<1x2048xf32, #tpu.memory_space<any>>
    %6 = tpu.memref_slice %arg2[%c0_i32_4] : memref<1x!tpu.dma_semaphore, #tpu.memory_space<semaphore_mem>> -> memref<1x!tpu.dma_semaphore, #tpu.memory_space<semaphore_mem>>
    %7 = tpu.memref_squeeze %6 : memref<1x!tpu.dma_semaphore, #tpu.memory_space<semaphore_mem>> -> memref<!tpu.dma_semaphore, #tpu.memory_space<semaphore_mem>>
    tpu.wait_dma2 semaphore(%7 : memref<!tpu.dma_semaphore, #tpu.memory_space<semaphore_mem>>) src(%4 : memref<1x2048xf32, #tpu.memory_space<any>>) dst(%5 : memref<1x2048xf32, #tpu.memory_space<any>>)
    return
  }
}

</mosaic_0001>

<bundles_post_ra>
// kernel: tpu_custom_call.1
= control target key start
LH: loop header
LB: loop body
LE: loop exit
PB: predicated region body
PF: predicated region fallthrough
CT: control target
= control target key end

     0   :  { %s34_s6 = smov [#allocation2]   ;;  %s35_s7 = smov [#allocation3]   ;;  %s53_s0 = inlined_call_operand.hbm [shape: f32[1,2048], index: 0, kind: input, shape index: {}]   ;;  %s54_s1 = inlined_call_operand.hbm [shape: f32[1,2048], index: 1, kind: output, shape index: {}]  }
   0x1   :  { %s36_s8 = smov 0  }
   0x2   :  { %18 = dma.general %s53_s0, 256, %s54_s1, %s34_s6, %s35_s7, [#allocation4], %s36_s8, 0  }
   0x3   :  { %32 = dma.done.wait [#allocation2], 256 }
   0x4   :  { %33 = vsyncadd [#allocation2], 4294967040 }
   0x5   :  { %22 = vsyncmov [#allocation2] }
   0x8   :  { %s23_s13 = vpop.sfrf %22 }
   0x9   :  { %p28_p0 = scmp.ne.s32.totalorder %s23_s13, 0 }
   0xb   :  { %27 = shalt.err (%p28_p0)  }

</bundles_post_ra>
